<compile_context>
chip_gen: v6e
topology: v6e:2x2x1
jax: 0.10.0
libtpu: 0.0.40
codegen_flags: <defaults>
</compile_context>

<pallas_src>
import math

import jax
import jax.numpy as jnp
from jax.experimental import pallas as pl
from jax.experimental.pallas import tpu as pltpu


def _build_pe(model_dim: int, max_len: int = 5000, dtype=jnp.float32) -> jnp.ndarray:
    """Deterministic positional-encoding buffer, identical math to the PyTorch __init__.

    Returns pe of shape (max_len, 1, model_dim)."""
    assert model_dim % 2 == 0, "model_dim must be even (same limitation as the PyTorch module)"
    position = jnp.arange(0, max_len, dtype=jnp.float32)[:, None]            # (max_len, 1)
    div_term = jnp.exp(
        jnp.arange(0, model_dim, 2, dtype=jnp.float32) * (-math.log(10000.0) / model_dim)
    )                                                                         # (model_dim/2,)
    angles = position * div_term                                              # (max_len, D/2)
    pe = jnp.zeros((max_len, model_dim), dtype=jnp.float32)
    pe = pe.at[:, 0::2].set(jnp.sin(angles))
    pe = pe.at[:, 1::2].set(jnp.cos(angles))
    # unsqueeze(0).transpose(0,1) -> (max_len, 1, model_dim)
    return pe[:, None, :].astype(dtype)


def _round_up(a: int, m: int) -> int:
    return ((a + m - 1) // m) * m


def _lcm(a: int, b: int) -> int:
    return a * b // math.gcd(a, b)


def _tpu_generation() -> str:
    try:
        kind = jax.devices()[0].device_kind.lower()
    except Exception:
        return "unknown"
    if "v5" in kind:
        return "v5e"
    if "v6" in kind:
        return "v6e"
    if "v7" in kind or "7x" in kind:
        return "v7x"
    return "unknown"


def _live_bytes(rows: int, lane_cols: int, D: int, x_item: int, pe_item: int) -> int:
    """Real live set: x-in + out blocks and the pe block, all double-buffered."""
    return 2 * (2 * rows * lane_cols * x_item + rows * D * pe_item)


def _pick_lane_tile(BD: int, D: int, x_item: int, pe_item: int, gen: str,
                    budget_bytes: int) -> int:
    """Lane-axis tile: a multiple of lcm(D, 128) dividing B*D, or the full B*D.

    Only shrinks below B*D when an 8-row seq block would blow the VMEM budget, or (on
    v7x) when a single row is very wide - keeps blocks lane-dense (multiple of 128)."""
    unit = _lcm(D, 128)
    if BD % unit != 0 or BD <= unit:
        return BD  # cannot tile lanes cleanly; use the full (lane-dense iff BD%128==0) row
    candidates = [m * unit for m in range(1, BD // unit + 1) if BD % (m * unit) == 0]

    def too_big(lt: int) -> bool:
        if _live_bytes(8, lt, D, x_item, pe_item) > budget_bytes:
            return True
        if gen in ("v7x", "unknown") and lt * x_item > (512 << 10):
            return True
        return False

    for lt in sorted(candidates, reverse=True):
        if not too_big(lt):
            return lt
    return candidates[0]  # smallest clean lane tile; budget math falls back to 8-row blocks


def _pick_seq_tile(S: int, lane_tile: int, D: int, x_item: int, pe_item: int,
                   gen: str, budget_bytes: int, n_lane_blocks: int) -> int:
    """Largest multiple-of-8 seq tile whose double-buffered live set fits the budget."""
    if S <= 8:
        return S  # single block; sublane dim equals the full (tiny) array extent
    per_row = _live_bytes(1, lane_tile, D, x_item, pe_item)
    tile = max(8, (budget_bytes // max(per_row, 1)) // 8 * 8)
    if gen in ("v7x", "unknown"):
        # Feed both v7x TensorCores: aim for >= 4 roughly equal grid steps in total.
        want_seq_steps = max(1, 4 // max(n_lane_blocks, 1))
        if want_seq_steps > 1 and S >= 8 * want_seq_steps:
            tile = min(tile, _round_up(pl.cdiv(S, want_seq_steps), 8))
    # v5e / v6e: single TensorCore -> no forced multi-step grid; just fit the budget.
    tile = min(tile, max(8, (S // 8) * 8))  # first blocks in-bounds; last block may be ragged
    return tile


def _pos_enc_kernel(x_ref, pe_ref, o_ref):
    # x_ref/o_ref: (seq_tile, lane_tile); pe_ref: (seq_tile, D). lane_tile % D == 0.
    # Cast pe in-kernel (free VPU work in an HBM-bound kernel) instead of a wrapper pass.
    pe = pe_ref[...].astype(o_ref.dtype)
    D = pe_ref.shape[-1]
    reps = x_ref.shape[-1] // D  # static Python int
    if reps == 1:
        o_ref[...] = x_ref[...] + pe
    else:
        # Unrolled per-chunk add: pure vld+vadd+vst, no concatenate temporary in VMEM.
        for r in range(reps):
            sl = slice(r * D, (r + 1) * D)
            o_ref[:, sl] = x_ref[:, sl] + pe


def positional_encoding(x: jnp.ndarray, pe: jnp.ndarray, *, donate_x: bool = False):
    """x: (S, B, D) seq-first; pe: (max_len, 1, D). Returns x + pe[:S] (dtype of x)."""
    S, B, D = x.shape
    max_len = pe.shape[0]
    assert pe.shape == (max_len, 1, D), f"pe shape {pe.shape} incompatible with x {x.shape}"
    assert S <= max_len, "sequence longer than positional-encoding buffer"

    # pe as a dense 2-D operand in its STORED dtype (cast happens inside the kernel).
    pe_2d = pe.reshape(max_len, D)

    # Free re-layout: (S, B, D) -> (S, B*D). Seq on sublanes, B*D on lanes.
    BD = B * D
    x2 = x.reshape(S, BD)
    x_item = x2.dtype.itemsize
    pe_item = pe_2d.dtype.itemsize

    gen = _tpu_generation()
    if gen in ("v7x", "unknown"):
        budget_bytes, vmem_limit = 12 << 20, 40 << 20   # 64 MiB VMEM/TC on v7x -> headroom
    else:  # v5e / v6e: 128 MiB VMEM, single core -> big tiles, few grid steps
        budget_bytes, vmem_limit = 48 << 20, 96 << 20

    lane_tile = _pick_lane_tile(BD, D, x_item, pe_item, gen, budget_bytes)
    n_lane_blocks = BD // lane_tile
    seq_tile = _pick_seq_tile(S, lane_tile, D, x_item, pe_item, gen, budget_bytes,
                              n_lane_blocks)

    # Tiny-S path: make the pe block equal pe's full sublane extent so the (8,128) rule is
    # met on the sublane axis (cheap slice; only taken when S < 8).
    if S < 8:
        pe_2d = pe_2d[:S]

    grid = (pl.cdiv(S, seq_tile), n_lane_blocks)

    cost = pl.CostEstimate(
        flops=S * BD,
        transcendentals=0,
        bytes_accessed=2 * S * BD * x_item + S * D * pe_item,
    )

    out2 = pl.pallas_call(
        _pos_enc_kernel,
        out_shape=jax.ShapeDtypeStruct((S, BD), x.dtype),
        grid_spec=pltpu.PrefetchScalarGridSpec(
            num_scalar_prefetch=0,
            grid=grid,
            in_specs=[
                pl.BlockSpec((seq_tile, lane_tile), lambda i, j: (i, j)),
                pl.BlockSpec((seq_tile, D), lambda i, j: (i, 0)),
            ],
            out_specs=pl.BlockSpec((seq_tile, lane_tile), lambda i, j: (i, j)),
        ),
        compiler_params=pltpu.CompilerParams(
            dimension_semantics=("parallel", "parallel"),
            vmem_limit_bytes=vmem_limit,
        ),
        cost_estimate=cost,
        input_output_aliases={0: 0} if donate_x else {},
    )(x2, pe_2d)

    return out2.reshape(S, B, D)


if __name__ == "__main__":
    # Small shapes consistent with the module's forward: (seq, batch, model_dim)
    seq_len, batch, model_dim = 8, 2, 32
    max_len = 64  # deterministic buffer, built in-script (no checkpoint load)

    key = jax.random.PRNGKey(0)
    x = jax.random.normal(key, (seq_len, batch, model_dim), dtype=jnp.float32)

    pe = _build_pe(model_dim, max_len=max_len, dtype=jnp.float32)

    out = positional_encoding(x, pe)
    out = jax.block_until_ready(out)

    # Reference check in plain JAX (same semantics as the PyTorch forward).
    ref = x + pe[:seq_len]
    assert out.shape == x.shape and out.dtype == x.dtype
    assert jnp.allclose(out, ref, atol=1e-6), "mismatch vs reference"

    print("KERNEL_OK")
</pallas_src>

<mosaic_0001>
module attributes {stable_mosaic.version = 11 : i64} {
  func.func @_pos_enc_kernel(%arg0: i32, %arg1: i32, %arg2: memref<8x64xf32, #tpu.memory_space<vmem>>, %arg3: memref<8x32xf32, #tpu.memory_space<vmem>>, %arg4: memref<8x64xf32, #tpu.memory_space<vmem>>) attributes {dimension_semantics = [#tpu.dimension_semantics<parallel>, #tpu.dimension_semantics<parallel>], iteration_bounds = array<i64: 1, 1>, scalar_prefetch = 0 : i64, scratch_operands = 0 : i64, tpu.core_type = #tpu.core_type<tc>, window_params = [{transform_indices = @transform_0, window_bounds = array<i64: 8, 64>}, {transform_indices = @transform_1, window_bounds = array<i64: 8, 32>}, {transform_indices = @transform_2, window_bounds = array<i64: 8, 64>}]} {
    %c0 = arith.constant 0 : index
    %c0_0 = arith.constant 0 : index
    %0 = vector.load %arg3[%c0, %c0_0] : memref<8x32xf32, #tpu.memory_space<vmem>>, vector<8x32xf32>
    %c0_1 = arith.constant 0 : index
    %c0_2 = arith.constant 0 : index
    %1 = vector.load %arg2[%c0_1, %c0_2] : memref<8x64xf32, #tpu.memory_space<vmem>>, vector<8x32xf32>
    %2 = arith.addf %1, %0 : vector<8x32xf32>
    %c0_3 = arith.constant 0 : index
    %c0_4 = arith.constant 0 : index
    %3 = vector.load %arg4[%c0_3, %c0_4] : memref<8x64xf32, #tpu.memory_space<vmem>>, vector<8x32xf32>
    tpu.vector_store %arg4[%c0_3, %c0_4], %2 {strides = array<i32>} : memref<8x64xf32, #tpu.memory_space<vmem>>, vector<8x32xf32>,
    %c0_5 = arith.constant 0 : index
    %c32 = arith.constant 32 : index
    %4 = vector.load %arg2[%c0_5, %c32] : memref<8x64xf32, #tpu.memory_space<vmem>>, vector<8x32xf32>
    %5 = arith.addf %4, %0 : vector<8x32xf32>
    %c0_6 = arith.constant 0 : index
    %c32_7 = arith.constant 32 : index
    %6 = vector.load %arg4[%c0_6, %c32_7] : memref<8x64xf32, #tpu.memory_space<vmem>>, vector<8x32xf32>
    tpu.vector_store %arg4[%c0_6, %c32_7], %5 {strides = array<i32>} : memref<8x64xf32, #tpu.memory_space<vmem>>, vector<8x32xf32>,
    return
  }
  func.func @transform_0(%arg0: i32, %arg1: i32) -> (i32, i32) {
    %c0_i32 = arith.constant 0 : i32
    return %arg0, %arg1 : i32, i32
  }
  func.func @transform_1(%arg0: i32, %arg1: i32) -> (i32, i32) {
    %c0_i32 = arith.constant 0 : i32
    %c0_i32_0 = arith.constant 0 : i32
    return %arg0, %c0_i32 : i32, i32
  }
  func.func @transform_2(%arg0: i32, %arg1: i32) -> (i32, i32) {
    %c0_i32 = arith.constant 0 : i32
    return %arg0, %arg1 : i32, i32
  }
}

</mosaic_0001>

<bundles_post_ra>
// kernel: tpu_custom_call.1
= control target key start
LH: loop header
LB: loop body
LE: loop exit
PB: predicated region body
PF: predicated region fallthrough
CT: control target
= control target key end

     0   :  { %vm15_vm0 = vcmask 261120   ;;  %s89_s0 = inlined_call_operand.vmem [shape: f32[8,64], index: 0, kind: input, shape index: {}]   ;;  %s90_s1 = inlined_call_operand.vmem [shape: f32[64,32], index: 1, kind: input, shape index: {}]   ;;  %s91_s2 = inlined_call_operand.hbm [shape: f32[8,64], index: 2, kind: output, shape index: {}]  }
   0x1   :  { %v12_v0 = vld [vmem:[%s90_s1] sm:$0xff] }
   0x2   :  { %v13_v1 = vld [vmem:[%s89_s0] sm:$0xff] }
   0x3   :  { %7 = vsyncpa [#allocation3], 0  ;;  %v14_v2 = vadd.f32 %v13_v1, %v12_v0  ;;  %s63_s13 = smov 32   ;;  %s64_s14 = smov [#allocation2]   ;;  %vm23_vm1 = vcmask 523520  }
   0x4   :  { %19 = vrot.lane.b32.xlu0 %v12_v0, %s63_s13  ;;  %s31_s15 = sshll.u32 %s64_s14, 4  ;;  %s32_s15 = int_to_ptr.vmem [resolvable:$true] %s31_s15 }
   0x5   :  { %16 = vst.msk [vmem:[#allocation2] sm:$0xff] %vm15_vm0, %v14_v2  ;;  %s41_s16 = scalar_lea.vmem %s32_s15, 128  ;;  %p46_p1 = scmp.lt.s32.totalorder %s32_s15, %s32_s15 }
   0x6   :  { %p42_p0 = scmp.ne.s32.totalorder %s32_s15, %s41_s16  ;;  %p47_p2 = scmp.lt.s32.totalorder %s41_s16, %s41_s16 }
   0x8   :  { %p48_p3 = por %p47_p2, %p46_p1 }
   0xa   :  { %p49_p4 = pnand %p48_p3, %p42_p0 }
  0x76   :  { %v20_v3 = vpop.permute.xlu0 %19 }
  0x77   :  { %v22_v4 = vadd.f32 %v20_v3, %v13_v1 }
  0x79   :  { %24 = vst.msk [vmem:[#allocation2] sm:$0xff] %vm23_vm1, %v22_v4 }
  0x7a   :  { %52 = shalt.err (!%p49_p4)
}
  0x7b   :  { %34 = dma.vmem_to_hbm [thread:$0]  %s32_s15, 128, %s91_s2, [#allocation3]  }
  0x7c   :  { %61 = dma.done.wait [#allocation3], 128  }
  0x7d   :  { %62 = vsyncadd [#allocation3], 4294967168 }
  0x7e   :  { %38 = vsyncpa [#allocation3], 1 }

</bundles_post_ra>
